<compile_context>
chip_gen: v7x
topology: tpu7x:2x2x1
jax: 0.10.0
libtpu: 0.0.40
codegen_flags: <defaults>
</compile_context>

<pallas_src>
import functools

import jax
import jax.numpy as jnp
from jax import lax
from jax.experimental import pallas as pl
from jax.experimental.pallas import tpu as pltpu


# ---------------------------------------------------------------------------
# Helpers
# ---------------------------------------------------------------------------
def _int_pow(x, n):
    """x ** n for a small positive python int n via repeated multiplication (VPU only)."""
    acc = None
    base = x
    while n > 0:
        if n & 1:
            acc = base if acc is None else acc * base
        n >>= 1
        if n:
            base = base * base
    return acc


def _pick_tile(dim, multiple, cap):
    """Largest divisor of `dim` that is a multiple of `multiple` and <= cap.

    `dim` is always padded to a multiple of `multiple` by the caller, so the
    result is at least `multiple` (never a huge full-dim fallback).
    """
    t = min(dim, (max(cap, multiple) // multiple) * multiple)
    t = (t // multiple) * multiple
    while t > multiple:
        if dim % t == 0:
            return t
        t -= multiple
    return multiple


# ---------------------------------------------------------------------------
# Kernel
# ---------------------------------------------------------------------------
def _gem_kernel(x_ref, o_ref, *, p, eps, inv_hw, hw_valid, hw_tile, mask_tail):
    """One (bc_tile, hw_tile) block of GeM pooling.

    Accumulates sum(clamp(x, eps) ** p) over the spatial grid axis (axis 1,
    'arbitrary') directly into the resident f32 output block; on the last
    spatial step applies the mean and the 1/p power.
    """
    k = pl.program_id(1)

    @pl.when(k == 0)
    def _init():
        o_ref[...] = jnp.zeros_like(o_ref)

    x = x_ref[...].astype(jnp.float32)            # (bc_tile, hw_tile)
    x = jnp.maximum(x, eps)                       # clamp(min=eps) -> x > 0

    p_int = int(round(p))
    if abs(p - p_int) < 1e-12 and 1 <= p_int <= 32:
        xp = _int_pow(x, p_int)                   # VPU multiplies; no EUP in hot loop
    else:
        xp = jnp.exp(p * jnp.log(x))              # generic pow for non-integer p (EUP)

    if mask_tail:
        # Zero out padded spatial lanes (HW padded up to a multiple of 128).
        col = k * hw_tile + lax.broadcasted_iota(jnp.int32, x.shape, 1)
        xp = jnp.where(col < hw_valid, xp, 0.0)

    o_ref[...] += jnp.sum(xp, axis=-1, keepdims=True)    # (bc_tile, 1) f32 accumulator

    @pl.when(k == pl.num_programs(1) - 1)
    def _finalize():
        mean = o_ref[...] * inv_hw
        if abs(p - 1.0) < 1e-12:
            y = mean
        else:
            y = jnp.exp(jnp.log(mean) * (1.0 / p))       # mean**(1/p), once per (b, c)
        o_ref[...] = y


# ---------------------------------------------------------------------------
# Wrapper
# ---------------------------------------------------------------------------
def generalized_mean_pooling(x_nchw, *, p=3.0, eps=1e-6, block_bytes=8 * 1024 * 1024):
    """GeM pooling with output_size=1: (B, C, H, W) -> (B, C, 1, 1)."""
    B, C, H, W = x_nchw.shape
    hw = H * W
    bc = B * C

    # Flatten to 2D (pure reshape of contiguous NCHW, no transpose).
    x = x_nchw.reshape(bc, hw)

    # Pad the spatial axis to a multiple of 128 (contiguous 128-lane DMAs) and the
    # folded batch*channel axis to a multiple of 8 (full sublanes).  Pad values are
    # masked in-kernel / sliced off afterwards.
    hw_pad = -(-hw // 128) * 128
    bc_pad = -(-bc // 8) * 8
    if hw_pad != hw or bc_pad != bc:
        x = jnp.pad(x, ((0, bc_pad - bc), (0, hw_pad - hw)))

    itemsize = x.dtype.itemsize
    budget_elems = max(1, block_bytes // itemsize)        # dtype-aware block budget

    # Spatial (lane) tile first: as large as possible while leaving >= 8 sublanes.
    hw_cap = max(128, min(hw_pad, budget_elems // 8))
    hw_tile = _pick_tile(hw_pad, 128, hw_cap)

    # Batch*channel (sublane) tile fills the remaining budget; bounded so the narrow
    # (bc_tile, 1) output buffers stay small in VMEM.
    bc_cap = min(max(8, budget_elems // hw_tile), 4096)
    bc_tile = _pick_tile(bc_pad, 8, bc_cap)

    # v7x megacore: prefer >= 2 'parallel' grid steps when the tile is splittable.
    if bc_pad // bc_tile < 2:
        half = bc_tile // 2
        if half >= 8 and half % 8 == 0 and bc_pad % half == 0:
            bc_tile = half

    grid = (bc_pad // bc_tile, hw_pad // hw_tile)

    kernel = functools.partial(
        _gem_kernel,
        p=float(p),
        eps=float(eps),
        inv_hw=1.0 / float(hw),
        hw_valid=hw,
        hw_tile=hw_tile,
        mask_tail=(hw_pad != hw),
    )

    # VMEM: double-buffered input blocks + lane-padded narrow output blocks + slack.
    vmem_est = 2 * bc_tile * hw_tile * itemsize + 2 * bc_tile * 512 + (4 << 20)
    vmem_limit = min(max(vmem_est, 16 << 20), 32 << 20)

    out = pl.pallas_call(
        kernel,
        grid=grid,
        in_specs=[pl.BlockSpec((bc_tile, hw_tile), lambda i, k: (i, k))],
        out_specs=pl.BlockSpec((bc_tile, 1), lambda i, k: (i, 0)),
        out_shape=jax.ShapeDtypeStruct((bc_pad, 1), jnp.float32),
        compiler_params=pltpu.CompilerParams(
            dimension_semantics=("parallel", "arbitrary"),
            vmem_limit_bytes=int(vmem_limit),
        ),
    )(x)

    return out[:bc, 0].reshape(B, C, 1, 1).astype(x_nchw.dtype)


def _gem_reference(x, p, eps):
    xf = jnp.maximum(x.astype(jnp.float32), eps) ** p
    return jnp.mean(xf, axis=(2, 3), keepdims=True) ** (1.0 / p)


# ---------------------------------------------------------------------------
if __name__ == "__main__":
    root = jax.random.PRNGKey(0)
    k1, k2, k3 = jax.random.split(root, 3)

    p, eps = 3.0, 1e-6

    # Case 1: module-consistent small shape (NCHW), typical p = 3.
    x1 = jax.random.normal(k1, (2, 4, 16, 16), dtype=jnp.float32)
    fwd = jax.jit(functools.partial(generalized_mean_pooling, p=p, eps=eps))
    y1 = jax.block_until_ready(fwd(x1))
    assert y1.shape == (2, 4, 1, 1), y1.shape
    assert bool(jnp.all(jnp.isfinite(y1)))
    assert bool(jnp.allclose(y1, _gem_reference(x1, p, eps), rtol=1e-3, atol=1e-5))

    # Case 2: larger spatial extent with a small block budget -> exercises the
    # multi-step reduction / resident-output accumulator path.
    x2 = jax.random.normal(k2, (1, 8, 64, 64), dtype=jnp.float32)
    y2 = jax.block_until_ready(
        jax.jit(functools.partial(
            generalized_mean_pooling, p=p, eps=eps, block_bytes=64 * 1024))(x2))
    assert y2.shape == (1, 8, 1, 1), y2.shape
    assert bool(jnp.allclose(y2, _gem_reference(x2, p, eps), rtol=1e-3, atol=1e-5))

    # Case 3: p = 1 degenerates to plain global average pooling.
    y3 = jax.block_until_ready(
        jax.jit(functools.partial(generalized_mean_pooling, p=1.0, eps=eps))(x1))
    assert bool(jnp.allclose(y3, _gem_reference(x1, 1.0, eps), rtol=1e-3, atol=1e-5))

    # Case 4: HW = 7*7 = 49 (not a multiple of 128) -> exercises spatial padding +
    # in-kernel lane mask (the canonical CNN GeM head case).
    x4 = jax.random.normal(k3, (2, 16, 7, 7), dtype=jnp.float32)
    y4 = jax.block_until_ready(
        jax.jit(functools.partial(generalized_mean_pooling, p=p, eps=eps))(x4))
    assert y4.shape == (2, 16, 1, 1), y4.shape
    assert bool(jnp.allclose(y4, _gem_reference(x4, p, eps), rtol=1e-3, atol=1e-5))

    # Case 5: bf16 input (dtype-aware block budget, f32 accumulation in-kernel).
    x5 = x1.astype(jnp.bfloat16)
    y5 = jax.block_until_ready(
        jax.jit(functools.partial(generalized_mean_pooling, p=p, eps=eps))(x5))
    assert y5.dtype == jnp.bfloat16 and y5.shape == (2, 4, 1, 1)
    assert bool(jnp.allclose(y5.astype(jnp.float32), _gem_reference(x5, p, eps),
                             rtol=2e-2, atol=1e-2))

    print("KERNEL_OK")
</pallas_src>

<mosaic_0001>
module attributes {stable_mosaic.version = 11 : i64} {
  func.func @_gem_kernel(%arg0: i32, %arg1: i32, %arg2: memref<8x256xf32, #tpu.memory_space<vmem>>, %arg3: memref<8x1xf32, #tpu.memory_space<vmem>>) attributes {dimension_semantics = [#tpu.dimension_semantics<parallel>, #tpu.dimension_semantics<arbitrary>], iteration_bounds = array<i64: 1, 1>, scalar_prefetch = 0 : i64, scratch_operands = 0 : i64, tpu.core_type = #tpu.core_type<tc>, window_params = [{transform_indices = @transform_0, window_bounds = array<i64: 8, 256>}, {transform_indices = @transform_1, window_bounds = array<i64: 8, 1>}]} {
    %c0_i32 = arith.constant 0 : i32
    %0 = arith.cmpi eq, %arg1, %c0_i32 : i32
    %1 = arith.extui %0 : i1 to i32
    %c0_i32_0 = arith.constant 0 : i32
    %2 = arith.cmpi ne, %1, %c0_i32_0 : i32
    scf.if %2 {
      %cst_9 = arith.constant 0.000000e+00 : f32
      %16 = vector.broadcast %cst_9 : f32 to vector<8x1xf32>
      %c0_10 = arith.constant 0 : index
      %c0_11 = arith.constant 0 : index
      %17 = vector.load %arg3[%c0_10, %c0_11] : memref<8x1xf32, #tpu.memory_space<vmem>>, vector<8x1xf32>
      tpu.vector_store %arg3[%c0_10, %c0_11], %16 {strides = array<i32>} : memref<8x1xf32, #tpu.memory_space<vmem>>, vector<8x1xf32>,
    } else {
    }
    %c0 = arith.constant 0 : index
    %c0_1 = arith.constant 0 : index
    %3 = vector.load %arg2[%c0, %c0_1] : memref<8x256xf32, #tpu.memory_space<vmem>>, vector<8x256xf32>
    %cst = arith.constant 9.99999997E-7 : f32
    %4 = vector.broadcast %cst : f32 to vector<8x256xf32>
    %5 = arith.maximumf %3, %4 : vector<8x256xf32>
    %6 = arith.mulf %5, %5 : vector<8x256xf32>
    %7 = arith.mulf %5, %6 : vector<8x256xf32>
    %c0_2 = arith.constant 0 : index
    %c0_3 = arith.constant 0 : index
    %8 = vector.load %arg3[%c0_2, %c0_3] : memref<8x1xf32, #tpu.memory_space<vmem>>, vector<8x1xf32>
    %cst_4 = arith.constant dense<0.000000e+00> : vector<8xf32>
    %9 = vector.multi_reduction <add>, %7, %cst_4 [1] : vector<8x256xf32> to vector<8xf32>
    %10 = vector.shape_cast %9 : vector<8xf32> to vector<8x1xf32>
    %11 = arith.addf %8, %10 : vector<8x1xf32>
    %c0_5 = arith.constant 0 : index
    %c0_6 = arith.constant 0 : index
    %12 = vector.load %arg3[%c0_5, %c0_6] : memref<8x1xf32, #tpu.memory_space<vmem>>, vector<8x1xf32>
    tpu.vector_store %arg3[%c0_5, %c0_6], %11 {strides = array<i32>} : memref<8x1xf32, #tpu.memory_space<vmem>>, vector<8x1xf32>,
    %c0_i32_7 = arith.constant 0 : i32
    %13 = arith.cmpi eq, %arg1, %c0_i32_7 : i32
    %14 = arith.extui %13 : i1 to i32
    %c0_i32_8 = arith.constant 0 : i32
    %15 = arith.cmpi ne, %14, %c0_i32_8 : i32
    scf.if %15 {
      %c0_9 = arith.constant 0 : index
      %c0_10 = arith.constant 0 : index
      %16 = vector.load %arg3[%c0_9, %c0_10] : memref<8x1xf32, #tpu.memory_space<vmem>>, vector<8x1xf32>
      %cst_11 = arith.constant 3.906250e-03 : f32
      %17 = vector.broadcast %cst_11 : f32 to vector<8x1xf32>
      %18 = arith.mulf %16, %17 : vector<8x1xf32>
      %19 = math.log %18 : vector<8x1xf32>
      %cst_12 = arith.constant 0.333333343 : f32
      %20 = vector.broadcast %cst_12 : f32 to vector<8x1xf32>
      %21 = arith.mulf %19, %20 : vector<8x1xf32>
      %22 = math.exp %21 : vector<8x1xf32>
      %c0_13 = arith.constant 0 : index
      %c0_14 = arith.constant 0 : index
      %23 = vector.load %arg3[%c0_13, %c0_14] : memref<8x1xf32, #tpu.memory_space<vmem>>, vector<8x1xf32>
      tpu.vector_store %arg3[%c0_13, %c0_14], %22 {strides = array<i32>} : memref<8x1xf32, #tpu.memory_space<vmem>>, vector<8x1xf32>,
    } else {
    }
    return
  }
  func.func @transform_0(%arg0: i32, %arg1: i32) -> (i32, i32) {
    %c0_i32 = arith.constant 0 : i32
    return %arg0, %arg1 : i32, i32
  }
  func.func @transform_1(%arg0: i32, %arg1: i32) -> (i32, i32) {
    %c0_i32 = arith.constant 0 : i32
    %c0_i32_0 = arith.constant 0 : i32
    return %arg0, %c0_i32 : i32, i32
  }
}

</mosaic_0001>

<bundles_post_ra>
// kernel: squeeze.1
= control target key start
LH: loop header
LB: loop body
LE: loop exit
PB: predicated region body
PF: predicated region fallthrough
CT: control target
= control target key end

     0   :  { %s85_s0 = inlined_call_operand.vmem [shape: f32[8], index: 0, kind: input, shape index: {}]   ;;  %s86_s1 = inlined_call_operand.hbm [shape: f32[2,4,1,1], index: 1, kind: output, shape index: {}]  }
   0x1   :  { %v5_v0 = vld [vmem:[%s85_s0] sm:$0x1] }
   0x2   :  { %2 = vsyncpa [#allocation1], 0  ;;  %6 = vst [vmem:[#allocation3] sm:$0x1] %v5_v0  ;;  %vm8_vm0 = vcmask 31744   ;;  %s58_s0 = smov 124  }
   0x3   :  { %s59_s8 = smov [#allocation0]  }
   0x4   :  { %s26_s9 = sshll.u32 %s59_s8, 4  ;;  %s27_s9 = int_to_ptr.vmem [resolvable:$true] %s26_s9 }
   0x5   :  { %s34_s10 = scalar_lea.vmem %s27_s9, 32  ;;  %p39_p1 = scmp.lt.s32.totalorder %s27_s9, %s27_s9 }
   0x6   :  { %p35_p0 = scmp.ne.s32.totalorder %s27_s9, %s34_s10  ;;  %p40_p2 = scmp.lt.s32.totalorder %s34_s10, %s34_s10 }
   0x8   :  { %p41_p3 = por %p40_p2, %p39_p1 }
   0x9   :  { %v10_v1 = vld [vmem:[#allocation3] sm:$0x1]  }
   0xa   :  { %v7_v2 = vld [vmem:[#allocation3] sm:$0x1]   ;;  %11 = vrot.lane.b32.xlu0 %v10_v1, %s58_s0  ;;  %p42_p4 = pnand %p41_p3, %p35_p0 }
   0xb   :  { %9 = vst.msk [vmem:[#allocation2] sm:$0x1] %vm8_vm0, %v7_v2  }
  0x7c   :  { %v12_v3 = vpop.permute.xlu0 %11  }
  0x7d   :  { %15 = vst.msk [vmem:[#allocation2 + $0x1] sm:$0x1] %vm8_vm0, %v12_v3  }
  0x84   :  { %v19_v4 = vld [vmem:[#allocation2] sm:$0x3] }
  0x85   :  { %21 = vst [vmem:[#allocation0] sm:$0x3] %v19_v4 }
  0x86   :  { %45 = shalt.err (!%p42_p4)
}
  0x87   :  { %s46_s13 = scalar_lea.hbm %s86_s1, 32 }
  0x88   :  { %p47_p5 = scmp.ne.s32.totalorder %s86_s1, %s46_s13  ;;  %p50_p6 = scmp.lt.u32.totalorder %s46_s13, %s86_s1 }
  0x8a   :  { %p52_p7 = pnand %p50_p6, %p47_p5 }
  0x8c   :  { %55 = shalt.err (!%p52_p7)
}
  0x8d   :  { %29 = dma.vmem_to_hbm [thread:$0]  %s27_s9, 32, %s86_s1, [#allocation1]  }
  0x8e   :  { %56 = dma.done.wait [#allocation1], 32  }
  0x8f   :  { %57 = vsyncadd [#allocation1], 4294967264 }
  0x90   :  { %31 = vsyncpa [#allocation1], 1 }

// kernel: generalized_mean_pooling.1
= control target key start
LH: loop header
LB: loop body
LE: loop exit
PB: predicated region body
PF: predicated region fallthrough
CT: control target
= control target key end

     0   :  { %vm12_vm0 = vcmask 7168   ;;  %v49_v2 = vmov 0.0   ;;  %s84_s0 = inlined_call_operand.vmem [shape: f32[8,256], index: 0, kind: input, shape index: {}]   ;;  %s85_s1 = inlined_call_operand.vmem [shape: f32[8,1], index: 1, kind: output, shape index: {}]  }
   0x1   :  { %v14_v0 = vld [vmem:[%s84_s0] sm:$0xff]  ;;  %v15_v1 = vld [vmem:[%s84_s0 + $0x8] sm:$0xff]  ;;  %13 = vst.msk [vmem:[%s85_s1] sm:$0xff] %vm12_vm0, %v49_v2 }
   0x2   :  { %v16_v3 = vmax.f32 %v14_v0, 1e-06  ;;  %v17_v4 = vmax.f32 %v15_v1, 1e-06 }
   0x4   :  { %v18_v5 = vmul.f32 %v16_v3, %v16_v3  ;;  %v19_v6 = vmul.f32 %v17_v4, %v17_v4 }
   0x6   :  { %v20_v7 = vmul.f32 %v18_v5, %v16_v3  ;;  %v21_v8 = vmul.f32 %v19_v6, %v17_v4 }
   0x8   :  { %v23_v9 = vadd.f32 %v21_v8, %v20_v7  ;;  %v22_v10 = vld [vmem:[%s85_s1] sm:$0xff] }
   0xa   :  { %24 = vadd.xlane.f32.xlu0 %v23_v9 }
  0x97   :  { %v25_v11 = vpop.xlane.xlu0 %24 }
  0x98   :  { %v26_v12 = vadd.f32 %v25_v11, %v22_v10 }
  0x9a   :  { %28 = vst.msk [vmem:[%s85_s1] sm:$0xff] %vm12_vm0, %v26_v12 }
  0xa1   :  { %v32_v13 = vld [vmem:[%s85_s1] sm:$0xff] }
  0xa2   :  { %v33_v14 = vmul.f32 0.00390625, %v32_v13 }
  0xa4   :  { %45 = vlog2.f32 %v33_v14 }
  0xae   :  { %v46_v15 = vpop.eup %45 }
  0xaf   :  { %v35_v16 = vmul.f32 0.6931472, %v46_v15 }
  0xb1   :  { %v36_v17 = vmul.f32 0.33333334, %v35_v16 }
  0xb3   :  { %v37_v18 = vmul.f32 1.442695, %v36_v17 }
  0xb5   :  { %47 = vpow2.f32 %v37_v18 }
  0xbf   :  { %v48_v19 = vpop.eup %47 }
  0xc0   :  { %39 = vst.msk [vmem:[%s85_s1] sm:$0xff] %vm12_vm0, %v48_v19 }

</bundles_post_ra>
